<compile_context>
chip_gen: v7x
topology: tpu7x:2x2x1
jax: 0.10.0
libtpu: 0.0.40
codegen_flags: <defaults>
</compile_context>

<pallas_src>
import math

import jax
import jax.numpy as jnp
from jax.experimental import pallas as pl
from jax.experimental.pallas import tpu as pltpu

_LANES = 128
_MAX_BLOCK_ROWS = 8192                    # 4 MiB f32 per input buffer at most
_VMEM_INPUT_BUDGET = 12 * 1024 * 1024     # budget for double-buffered input streams
_VMEM_LIMIT_BYTES = 32 * 1024 * 1024      # headroom; safe on v5e/v6e/v7x

_NUM_TC_CACHE = None


def _num_tensorcores():
    """Best-effort TensorCores-per-chip (2 only on dual-TC / megacore parts)."""
    global _NUM_TC_CACHE
    if _NUM_TC_CACHE is not None:
        return _NUM_TC_CACHE
    tc = 1
    try:
        info = pltpu.get_tpu_info()
        for attr in ("num_cores", "core_count", "num_tensorcores",
                     "tensorcores_per_chip"):
            v = getattr(info, attr, None)
            if isinstance(v, int) and v >= 2:
                tc = 2
                break
    except Exception:
        pass
    if tc == 1:
        try:
            kind = (getattr(jax.devices()[0], "device_kind", "") or "").lower()
            if ("v4" in kind) or ("v5p" in kind) or ("v7" in kind):
                tc = 2
        except Exception:
            pass
    _NUM_TC_CACHE = tc
    return tc


# ----------------------------------------------------------------------------- kernels
def _build_reduce_kernel(compute, num_inputs, *, block_rows, nsteps, num_blocks,
                         valid_rows_last, acc_sublanes, gate_all):
    """Kernel accumulating sum(compute(*inputs)) over the valid slab rows.

    Fast (unmasked) path for 100%-valid blocks; cold row-masked path only for the
    single ragged last block; whole clamped OOB steps skipped via scalar pl.when.
    """
    ragged = valid_rows_last < block_rows
    full_blocks = num_blocks - 1 if ragged else num_blocks

    def _accumulate(in_refs, o_ref, masked):
        vals = compute(*(r[...].astype(jnp.float32) for r in in_refs))
        if masked:
            row = jax.lax.broadcasted_iota(jnp.int32, (block_rows, _LANES), 0)
            vals = jnp.where(row < valid_rows_last, vals, 0.0)
        if acc_sublanes == 8:
            # vreg-wise VPU adds only (no cross-sublane XLU reduce per step)
            upd = vals.reshape(-1, 8, _LANES).sum(axis=0)
        else:
            # tiny block whose row count is not a multiple of 8
            upd = jnp.sum(vals, axis=0, keepdims=True)
        o_ref[...] += upd[None]

    def kernel(*refs):
        in_refs = refs[:num_inputs]
        o_ref = refs[num_inputs]
        i = pl.program_id(1)

        @pl.when(i == 0)
        def _():
            o_ref[...] = jnp.zeros_like(o_ref)

        pid = pl.program_id(0) * nsteps + i

        if ragged or gate_all:
            @pl.when(pid < full_blocks)              # hot path: no per-element mask
            def _():
                _accumulate(in_refs, o_ref, masked=False)

            if ragged:
                @pl.when(pid == num_blocks - 1)      # cold path: single ragged block
                def _():
                    _accumulate(in_refs, o_ref, masked=True)
        else:
            _accumulate(in_refs, o_ref, masked=False)

    return kernel


# ------------------------------------------------------------------------------- glue
def _to_slab(x):
    """(rows, 128) view of the lane-aligned prefix + (optional) <128-elem tail.

    No padding / full-array copy: aligned inputs are a free reshape; otherwise
    the tiny tail is split off and reduced in plain XLA by the caller."""
    flat = jnp.ravel(x)
    n = flat.shape[0]
    rows = n // _LANES
    aligned = rows * _LANES
    if rows == 0:
        return None, (flat if n else None)
    if aligned == n:
        return flat.reshape(rows, _LANES), None
    return flat[:aligned].reshape(rows, _LANES), flat[aligned:]


def _reduce_slabs(compute, slabs, *, ncores=None):
    rows = slabs[0].shape[0]
    for s in slabs:
        assert s.shape == (rows, _LANES)

    itemsize = max(jnp.dtype(s.dtype).itemsize for s in slabs)
    max_rows = _VMEM_INPUT_BUDGET // (len(slabs) * 2 * _LANES * itemsize)
    max_rows = max(8, min(max_rows, _MAX_BLOCK_ROWS))
    if rows <= max_rows:
        block_rows = rows                       # single block == full array dim
    else:
        block_rows = (max_rows // 8) * 8        # keep (8,128) alignment

    num_blocks = pl.cdiv(rows, block_rows)
    if ncores is None:
        ncores = _num_tensorcores() if num_blocks >= 2 else 1
    ncores = max(1, min(ncores, num_blocks))
    nsteps = pl.cdiv(num_blocks, ncores)
    gate_all = ncores * nsteps > num_blocks
    valid_rows_last = rows - (num_blocks - 1) * block_rows
    acc_sublanes = 8 if block_rows % 8 == 0 else 1
    last_block = num_blocks - 1

    if gate_all:
        def in_index(c, i):
            return (jnp.minimum(c * nsteps + i, last_block), 0)
    else:
        def in_index(c, i):
            return (c * nsteps + i, 0)

    kernel = _build_reduce_kernel(
        compute, len(slabs), block_rows=block_rows, nsteps=nsteps,
        num_blocks=num_blocks, valid_rows_last=valid_rows_last,
        acc_sublanes=acc_sublanes, gate_all=gate_all)

    out = pl.pallas_call(
        kernel,
        out_shape=jax.ShapeDtypeStruct((ncores, acc_sublanes, _LANES), jnp.float32),
        grid_spec=pltpu.PrefetchScalarGridSpec(
            num_scalar_prefetch=0,
            grid=(ncores, nsteps),
            in_specs=[pl.BlockSpec((block_rows, _LANES), in_index) for _ in slabs],
            out_specs=pl.BlockSpec((1, acc_sublanes, _LANES),
                                   lambda c, i: (c, 0, 0)),
        ),
        compiler_params=pltpu.CompilerParams(
            dimension_semantics=("parallel", "arbitrary"),
            vmem_limit_bytes=_VMEM_LIMIT_BYTES),
    )(*slabs)
    # Final 8x128 (+ cross-core) reduce is tiny; do it once in plain XLA.
    return jnp.sum(out)


def _log_vals(x):
    return jnp.log(x)


def _sse_vals(x, t, w):
    d = (x - t) / w          # single exact divide (approx reciprocal risks 1e-5 rtol)
    return d * d


def sum_log(x, *, ncores=None):
    """sum(log(x)) over all elements via a Pallas lane-dense reduction."""
    slab, tail = _to_slab(x)
    total = jnp.float32(0.0)
    if slab is not None:
        total = total + _reduce_slabs(_log_vals, [slab], ncores=ncores)
    if tail is not None:
        total = total + jnp.sum(jnp.log(tail.astype(jnp.float32)))
    return total


def weighted_sse(x_hat, target, weight, *, ncores=None):
    """sum(((x_hat - target) / weight)^2) over all elements."""
    sx, tx = _to_slab(x_hat)
    st, tt = _to_slab(target)
    sw, tw = _to_slab(weight)
    total = jnp.float32(0.0)
    if sx is not None:
        total = total + _reduce_slabs(_sse_vals, [sx, st, sw], ncores=ncores)
    if tx is not None:
        d = (tx.astype(jnp.float32) - tt.astype(jnp.float32)) / tw.astype(jnp.float32)
        total = total + jnp.sum(d * d)
    return total


def rate_distortion_loss(output, target, weight, lmbda=0.01):
    """JAX/Pallas equivalent of RateDistortionLoss.forward."""
    x_hat = output["x_hat"]
    assert x_hat.shape == target.shape == weight.shape
    N, C, H, W = target.shape
    num_pixels = N * H * W
    denom = -math.log(2) * num_pixels

    out = {}
    # One small launch per likelihood tensor -- no wrapper-side concatenate copy.
    out["bpp_loss"] = sum(sum_log(lk) / denom
                          for lk in output["likelihoods"].values())
    sse = weighted_sse(x_hat, target, weight)
    out["mse_loss"] = sse / jnp.float32(N * C * H * W)
    out["loss"] = lmbda * (255.0 ** 2) * out["mse_loss"] + out["bpp_loss"]
    return out


# ------------------------------------------------------------------------------- main
if __name__ == "__main__":
    key = jax.random.PRNGKey(0)
    k1, k2, k3, k4, k5, k6, k7, k8 = jax.random.split(key, 8)

    N, C, H, W = 2, 4, 16, 16
    x_hat = jax.random.normal(k1, (N, C, H, W), dtype=jnp.float32)
    target = jax.random.normal(k2, (N, C, H, W), dtype=jnp.float32)
    weight = jax.random.uniform(k3, (N, C, H, W), minval=0.5, maxval=2.0,
                                dtype=jnp.float32)

    # likelihoods in (0, 1], two "codes" as a typical compression model produces
    lk_y = jax.random.uniform(k4, (N, 8, 4, 4), minval=0.05, maxval=1.0,
                              dtype=jnp.float32)
    lk_z = jax.random.uniform(k5, (N, 4, 2, 2), minval=0.05, maxval=1.0,
                              dtype=jnp.float32)

    output = {"x_hat": x_hat, "likelihoods": {"y": lk_y, "z": lk_z}}

    out = rate_distortion_loss(output, target, weight, lmbda=0.01)
    jax.block_until_ready(out["loss"])

    # reference check in plain JAX
    num_pixels = N * H * W
    ref_bpp = (jnp.sum(jnp.log(lk_y)) + jnp.sum(jnp.log(lk_z))) / (-math.log(2) * num_pixels)
    ref_mse = jnp.mean((x_hat - target) ** 2 / weight ** 2)
    ref_loss = 0.01 * 255.0 ** 2 * ref_mse + ref_bpp
    assert jnp.allclose(out["bpp_loss"], ref_bpp, rtol=1e-5, atol=1e-5)
    assert jnp.allclose(out["mse_loss"], ref_mse, rtol=1e-5, atol=1e-5)
    assert jnp.allclose(out["loss"], ref_loss, rtol=1e-5, atol=1e-5)

    # extra checks: multi-block slab with a ragged last block, a clamped OOB step
    # (forced 2-way core split over an odd block count) and a <128-element tail.
    n_odd = 9000 * 128 + 50
    xa = jax.random.normal(k6, (n_odd,), dtype=jnp.float32)
    xb = jax.random.normal(k7, (n_odd,), dtype=jnp.float32)
    xw = jax.random.uniform(k8, (n_odd,), minval=0.5, maxval=2.0, dtype=jnp.float32)
    got_sse = weighted_sse(xa, xb, xw, ncores=2)
    ref_sse = jnp.sum(((xa - xb) / xw) ** 2)
    assert jnp.allclose(got_sse, ref_sse, rtol=5e-4), (got_sse, ref_sse)

    lk_big = jax.random.uniform(k6, (1_200_003,), minval=0.05, maxval=1.0,
                                dtype=jnp.float32)
    got_log = sum_log(lk_big)
    ref_log = jnp.sum(jnp.log(lk_big))
    assert jnp.allclose(got_log, ref_log, rtol=5e-4), (got_log, ref_log)

    jax.block_until_ready((got_sse, got_log))
    print("KERNEL_OK")
</pallas_src>

<mosaic_0001>
module attributes {stable_mosaic.version = 11 : i64} {
  func.func @kernel(%arg0: i32, %arg1: i32, %arg2: memref<2x128xf32, #tpu.memory_space<vmem>>, %arg3: memref<1x1x128xf32, #tpu.memory_space<vmem>>) attributes {dimension_semantics = [#tpu.dimension_semantics<parallel>, #tpu.dimension_semantics<arbitrary>], iteration_bounds = array<i64: 1, 1>, scalar_prefetch = 0 : i64, scratch_operands = 0 : i64, tpu.core_type = #tpu.core_type<tc>, window_params = [{transform_indices = @transform_0, window_bounds = array<i64: 2, 128>}, {transform_indices = @transform_1, window_bounds = array<i64: 1, 1, 128>}]} {
    %c0_i32 = arith.constant 0 : i32
    %0 = arith.cmpi eq, %arg1, %c0_i32 : i32
    %1 = arith.extui %0 : i1 to i32
    %c0_i32_0 = arith.constant 0 : i32
    %2 = arith.cmpi ne, %1, %c0_i32_0 : i32
    scf.if %2 {
      %cst_8 = arith.constant 0.000000e+00 : f32
      %11 = vector.broadcast %cst_8 : f32 to vector<1x1x128xf32>
      %c0_9 = arith.constant 0 : index
      %c0_10 = arith.constant 0 : index
      %c0_11 = arith.constant 0 : index
      %12 = vector.load %arg3[%c0_9, %c0_10, %c0_11] : memref<1x1x128xf32, #tpu.memory_space<vmem>>, vector<1x1x128xf32>
      tpu.vector_store %arg3[%c0_9, %c0_10, %c0_11], %11 {strides = array<i32>} : memref<1x1x128xf32, #tpu.memory_space<vmem>>, vector<1x1x128xf32>,
    } else {
    }
    %c0 = arith.constant 0 : index
    %c0_1 = arith.constant 0 : index
    %3 = vector.load %arg2[%c0, %c0_1] : memref<2x128xf32, #tpu.memory_space<vmem>>, vector<2x128xf32>
    %4 = math.log %3 : vector<2x128xf32>
    %cst = arith.constant dense<0.000000e+00> : vector<128xf32>
    %5 = vector.multi_reduction <add>, %4, %cst [0] : vector<2x128xf32> to vector<128xf32>
    %6 = vector.shape_cast %5 : vector<128xf32> to vector<1x128xf32>
    %c0_2 = arith.constant 0 : index
    %c0_3 = arith.constant 0 : index
    %c0_4 = arith.constant 0 : index
    %7 = vector.load %arg3[%c0_2, %c0_3, %c0_4] : memref<1x1x128xf32, #tpu.memory_space<vmem>>, vector<1x1x128xf32>
    %8 = vector.shape_cast %6 : vector<1x128xf32> to vector<1x1x128xf32>
    %9 = arith.addf %7, %8 : vector<1x1x128xf32>
    %c0_5 = arith.constant 0 : index
    %c0_6 = arith.constant 0 : index
    %c0_7 = arith.constant 0 : index
    %10 = vector.load %arg3[%c0_5, %c0_6, %c0_7] : memref<1x1x128xf32, #tpu.memory_space<vmem>>, vector<1x1x128xf32>
    tpu.vector_store %arg3[%c0_5, %c0_6, %c0_7], %9 {strides = array<i32>} : memref<1x1x128xf32, #tpu.memory_space<vmem>>, vector<1x1x128xf32>,
    return
  }
  func.func @transform_0(%arg0: i32, %arg1: i32) -> (i32, i32) {
    %c1_i32 = arith.constant 1 : i32
    %0 = arith.muli %arg0, %c1_i32 : i32
    %1 = arith.addi %0, %arg1 : i32
    %c0_i32 = arith.constant 0 : i32
    %c0_i32_0 = arith.constant 0 : i32
    return %1, %c0_i32 : i32, i32
  }
  func.func @transform_1(%arg0: i32, %arg1: i32) -> (i32, i32, i32) {
    %c0_i32 = arith.constant 0 : i32
    %c0_i32_0 = arith.constant 0 : i32
    %c0_i32_1 = arith.constant 0 : i32
    return %arg0, %c0_i32, %c0_i32_0 : i32, i32, i32
  }
}

</mosaic_0001>

<bundles_post_ra>
// kernel: tpu_custom_call.1
= control target key start
LH: loop header
LB: loop body
LE: loop exit
PB: predicated region body
PF: predicated region fallthrough
CT: control target
= control target key end

     0   :  { %6 = vsyncpa [#allocation3], 0  ;;  %s149_s0 = inlined_call_operand.hbm [shape: f32[2,128], index: 0, kind: input, shape index: {}]   ;;  %s150_s1 = inlined_call_operand.hbm [shape: f32[1,1,128], index: 1, kind: output, shape index: {}]  }
   0x1   :  { %7 = vsyncpa [#allocation4], 0  ;;  %s112_s6 = smov [#allocation2]   ;;  %s64_s10 = scalar_lea.hbm %s149_s0, 32 }
   0x2   :  { %s17_s7 = sshll.u32 %s112_s6, 4  ;;  %p65_p0 = scmp.ne.s32.totalorder %s149_s0, %s64_s10  ;;  %s18_s7 = int_to_ptr.vmem [resolvable:$true] %s17_s7 }
   0x3   :  { %p68_p1 = scmp.lt.u32.totalorder %s64_s10, %s149_s0 }
   0x5   :  { %p70_p2 = pnand %p68_p1, %p65_p0 }
   0x7   :  { %73 = shalt.err (!%p70_p2)
}
   0x8   :  { %s74_s15 = scalar_lea.vmem %s18_s7, 32  ;;  %p79_p4 = scmp.lt.s32.totalorder %s18_s7, %s18_s7 }
   0x9   :  { %p75_p3 = scmp.ne.s32.totalorder %s18_s7, %s74_s15  ;;  %p80_p5 = scmp.lt.s32.totalorder %s74_s15, %s74_s15 }
   0xb   :  { %p81_p6 = por %p80_p5, %p79_p4 }
   0xd   :  { %p82_p7 = pnand %p81_p6, %p75_p3 }
   0xf   :  { %85 = shalt.err (!%p82_p7)
}
  0x10   :  { %20 = dma.hbm_to_vmem [thread:$0]  %s149_s0, 32, %s18_s7, [#allocation3]  }
  0x11   :  { %108 = dma.done.wait [#allocation3], 32  }
  0x12   :  { %109 = vsyncadd [#allocation3], 4294967264  ;;  %v113_v0 = vmov 0.0   ;;  %v30_v1 = vld [vmem:[#allocation2] sm:$0x3]  ;;  %vm33_vm0 = vcmask 1041408  }
  0x13   :  { %29 = vst [vmem:[#allocation5] sm:$0x1] %v113_v0  ;;  %62 = vlog2.f32 %v30_v1  ;;  %s114_s18 = smov [#allocation5]  }
  0x14   :  { %s50_s19 = sshll.u32 %s114_s18, 4  ;;  %s51_s19 = int_to_ptr.vmem [resolvable:$true] %s50_s19 }
  0x15   :  { %s86_s0 = scalar_lea.vmem %s51_s19, 16  ;;  %s90_s20 = scalar_lea.vmem %s51_s19, 32 }
  0x16   :  { %p87_p8 = scmp.ne.s32.totalorder %s51_s19, %s86_s0  ;;  %p91_p9 = scmp.lt.s32.totalorder %s51_s19, %s51_s19 }
  0x17   :  { %p92_p10 = scmp.lt.s32.totalorder %s90_s20, %s86_s0 }
  0x19   :  { %p93_p11 = por %p92_p10, %p91_p9 }
  0x1a   :  { %v41_v10 = vld [vmem:[#allocation5] sm:$0x1] }
  0x1b   :  { %p94_p12 = pnand %p93_p11, %p87_p8 }
  0x1d   :  { %v63_v2 = vpop.eup %62 }
  0x1e   :  { %v32_v3 = vmul.f32 0.6931472, %v63_v2 }
  0x20   :  { %v34_v4 = vsel %vm33_vm0, %v32_v3, 0.0 }
  0x21   :  { %v35_v5 = vrot.slane %v34_v4, 4 }
  0x23   :  { %v36_v6 = vadd.f32 %v35_v5, %v34_v4 }
  0x25   :  { %v37_v7 = vrot.slane %v36_v6, 2 }
  0x27   :  { %v38_v8 = vadd.f32 %v37_v7, %v36_v6 }
  0x29   :  { %v39_v9 = vrot.slane %v38_v8, 1 }
  0x2b   :  { %v40_v11 = vadd.f32 %v39_v9, %v38_v8 }
  0x2d   :  { %v42_v12 = vadd.f32 %v41_v10, %v40_v11 }
  0x2f   :  { %43 = vst [vmem:[#allocation5] sm:$0x1] %v42_v12 }
  0x30   :  { %97 = shalt.err (!%p94_p12)
}
  0x31   :  { %s98_s23 = scalar_lea.hbm %s150_s1, 16 }
  0x32   :  { %p99_p13 = scmp.ne.s32.totalorder %s150_s1, %s98_s23  ;;  %p102_p0 = scmp.lt.u32.totalorder %s98_s23, %s150_s1 }
  0x34   :  { %p104_p1 = pnand %p102_p0, %p99_p13 }
  0x36   :  { %107 = shalt.err (!%p104_p1)
}
  0x37   :  { %53 = dma.vmem_to_hbm [thread:$0]  %s51_s19, 16, %s150_s1, [#allocation4]  }
  0x38   :  { %110 = dma.done.wait [#allocation4], 16  }
  0x39   :  { %111 = vsyncadd [#allocation4], 4294967280 }
  0x3a   :  { %57 = vsyncpa [#allocation3], 1 }
  0x3b   :  { %58 = vsyncpa [#allocation4], 1 }

</bundles_post_ra>
